<compile_context>
chip_gen: v5e
topology: v5e:2x2
jax: 0.10.0
libtpu: 0.0.40
codegen_flags: <defaults>
</compile_context>

<pallas_src>
import jax
import jax.numpy as jnp
from jax.experimental import pallas as pl
from jax.experimental.pallas import tpu as pltpu


_NEG_LARGE = -1e30  # sentinel logit for padded class lanes (exp underflows to 0)


def _round_up(n, m):
    return ((n + m - 1) // m) * m


def _mlp_softmax_kernel(x_ref, w1_ref, b1_ref, w2_ref, b2_ref, o_ref):
    # Hidden layer: (TB, D)bf16 @ (D, Hp)bf16 -> f32 accumulate, + b1, ReLU.
    h = jnp.dot(x_ref[...], w1_ref[...], preferred_element_type=jnp.float32)
    h = jnp.maximum(h + b1_ref[...], 0.0)

    # Output layer: cast the activation back to bf16 so the second matmul also
    # runs at native MXU rate; accumulate in f32.
    logits = jnp.dot(h.astype(jnp.bfloat16), w2_ref[...],
                     preferred_element_type=jnp.float32)
    # b2_ref carries -1e30 in the padded class lanes (W2 padded columns are 0),
    # so no in-kernel iota/compare/select is needed to mask them.
    logits = logits + b2_ref[...]

    # Numerically stable softmax along the class axis.  Exact divide: the
    # denominator is only (TB, 1) values, so approx reciprocal buys nothing.
    m = jnp.max(logits, axis=1, keepdims=True)
    e = jnp.exp(logits - m)
    denom = jnp.sum(e, axis=1, keepdims=True)
    o_ref[...] = (e / denom).astype(o_ref.dtype)


def prepare_params(W1, b1, W2, b2):
    """Pad / transpose / cast the Linear parameters once (loop-invariant).

    W1: [100, input_size] (torch Linear layout (out, in)), b1: [100]
    W2: [output_size, 100],                                b2: [output_size]
    """
    H, D = W1.shape
    C = W2.shape[0]
    Hp = _round_up(H, 128)   # hidden 100 -> 128 lanes
    Cp = _round_up(C, 128)   # classes -> lane-dense output slab
    bf16, f32 = jnp.bfloat16, jnp.float32

    w1_p = jnp.zeros((D, Hp), bf16).at[:, :H].set(W1.T.astype(bf16))
    b1_p = jnp.zeros((1, Hp), f32).at[0, :H].set(b1.astype(f32))
    w2_p = jnp.zeros((Hp, Cp), bf16).at[:H, :C].set(W2.T.astype(bf16))
    # Class mask folded into the bias: padded lanes get -1e30.
    b2_p = jnp.full((1, Cp), _NEG_LARGE, f32).at[0, :C].set(b2.astype(f32))

    return dict(w1_p=w1_p, b1_p=b1_p, w2_p=w2_p, b2_p=b2_p,
                input_size=D, hidden=H, num_classes=C)


def user_classifier_forward(x, params, *, block_b=2048, min_pallas_batch=1024,
                            force_pallas=False):
    """softmax(relu(x @ W1.T + b1) @ W2.T + b2, axis=1) -> [B, C] f32 probs."""
    B, D = x.shape
    assert D == params["input_size"]
    C = params["num_classes"]
    Hp = params["b1_p"].shape[1]
    Cp = params["b2_p"].shape[1]
    bf16, f32 = jnp.bfloat16, jnp.float32

    # Small-batch bypass: for tiny B the pad + custom-call launch + post-slice
    # dominate and XLA fuses this MLP well.
    if not force_pallas and B < min_pallas_batch:
        h = jnp.maximum(
            jnp.dot(x.astype(bf16), params["w1_p"],
                    preferred_element_type=f32) + params["b1_p"], 0.0)
        logits = jnp.dot(h.astype(bf16), params["w2_p"],
                         preferred_element_type=f32) + params["b2_p"]
        return jax.nn.softmax(logits, axis=1)[:, :C]

    # Batch tiling: sublane multiple of 8; aim for >=2 grid steps so the batch
    # axis can shard across v7x's two TensorCores.
    TB = min(block_b, _round_up(B, 8))
    if B > 8 and _round_up(B, TB) // TB < 2:
        TB = max(8, _round_up(-(-B // 2), 8))
    Bp = _round_up(B, TB)

    # Only x is staged per call (bf16, unpadded feature dim).
    x_p = jnp.zeros((Bp, D), bf16).at[:B, :].set(x.astype(bf16))

    cost = pl.CostEstimate(
        flops=2 * Bp * (D * Hp + Hp * Cp),
        transcendentals=Bp * Cp,  # exp in softmax
        bytes_accessed=(2 * (Bp * D + D * Hp + Hp * Cp)      # bf16 operands
                        + 4 * (Hp + Cp + Bp * Cp)),           # f32 biases + out
    )

    out_p = pl.pallas_call(
        _mlp_softmax_kernel,
        out_shape=jax.ShapeDtypeStruct((Bp, Cp), f32),
        grid_spec=pltpu.PrefetchScalarGridSpec(
            num_scalar_prefetch=0,
            grid=(Bp // TB,),
            in_specs=[
                # x tiles stream over the batch grid axis (double-buffered).
                pl.BlockSpec((TB, D), lambda i: (i, 0)),
                # Weights / biases: same block every step -> VMEM resident.
                pl.BlockSpec((D, Hp), lambda i: (0, 0)),
                pl.BlockSpec((1, Hp), lambda i: (0, 0)),
                pl.BlockSpec((Hp, Cp), lambda i: (0, 0)),
                pl.BlockSpec((1, Cp), lambda i: (0, 0)),
            ],
            # Lane-dense output slab -> unmasked stores.
            out_specs=pl.BlockSpec((TB, Cp), lambda i: (i, 0)),
        ),
        compiler_params=pltpu.CompilerParams(
            # Batch tiles are independent -> shard grid across v7x's 2 TCs.
            dimension_semantics=("parallel",),
            # Explicit, v7x(64 MiB)-safe budget; actual usage is ~1-2%.
            vmem_limit_bytes=32 * 1024 * 1024,
        ),
        cost_estimate=cost,
    )(x_p, params["w1_p"], params["b1_p"], params["w2_p"], params["b2_p"])

    # Strip batch/class padding.
    return out_p[:B, :C]


def xavier_normal(key, fan_out, fan_in):
    # Matches torch.nn.init.xavier_normal_ (gain=1): std = sqrt(2/(fan_in+fan_out))
    std = (2.0 / (fan_in + fan_out)) ** 0.5
    return std * jax.random.normal(key, (fan_out, fan_in), dtype=jnp.float32)


if __name__ == "__main__":
    # Small shapes consistent with the module's forward (x: [B, input_size]).
    B = 8
    INPUT_SIZE = 32
    HIDDEN = 100
    OUTPUT_SIZE = 6

    key = jax.random.PRNGKey(0)
    kx, kw1, kb1, kw2, kb2 = jax.random.split(key, 5)

    x = jax.random.normal(kx, (B, INPUT_SIZE), dtype=jnp.float32)

    # Parameters (xavier-normal weights like the PyTorch init; biases use
    # torch's default uniform range, generated deterministically).
    W1 = xavier_normal(kw1, HIDDEN, INPUT_SIZE)          # torch Linear weight: (out, in)
    b1 = (1.0 / INPUT_SIZE ** 0.5) * (
        2.0 * jax.random.uniform(kb1, (HIDDEN,), dtype=jnp.float32) - 1.0)
    W2 = xavier_normal(kw2, OUTPUT_SIZE, HIDDEN)
    b2 = (1.0 / HIDDEN ** 0.5) * (
        2.0 * jax.random.uniform(kb2, (OUTPUT_SIZE,), dtype=jnp.float32) - 1.0)

    params = prepare_params(W1, b1, W2, b2)

    # force_pallas=True so the test exercises the kernel even at B=8.
    out = user_classifier_forward(x, params, force_pallas=True)
    out = jax.block_until_ready(out)

    # Reference check in plain JAX f32 (same math as the PyTorch module).
    h_ref = jnp.maximum(x @ W1.T + b1, 0.0)
    ref = jax.nn.softmax(h_ref @ W2.T + b2, axis=1)

    assert out.shape == (B, OUTPUT_SIZE)
    # bf16 weights/activations (f32 accumulation) -> ~1e-2-level deviation
    # from the f32 reference is expected.
    assert jnp.allclose(out, ref, atol=2e-2, rtol=2e-2), float(jnp.max(jnp.abs(out - ref)))
    # Exact divide in the softmax -> rows sum to 1 to f32 roundoff.
    assert jnp.allclose(jnp.sum(out, axis=1), 1.0, atol=1e-5)

    print("KERNEL_OK")
</pallas_src>

<mosaic_0001>
module attributes {stable_mosaic.version = 11 : i64} {
  func.func @_mlp_softmax_kernel(%arg0: i32, %arg1: memref<8x32xbf16, #tpu.memory_space<vmem>>, %arg2: memref<32x128xbf16, #tpu.memory_space<vmem>>, %arg3: memref<1x128xf32, #tpu.memory_space<vmem>>, %arg4: memref<128x128xbf16, #tpu.memory_space<vmem>>, %arg5: memref<1x128xf32, #tpu.memory_space<vmem>>, %arg6: memref<8x128xf32, #tpu.memory_space<vmem>>) attributes {dimension_semantics = [#tpu.dimension_semantics<parallel>], iteration_bounds = array<i64: 1>, scalar_prefetch = 0 : i64, scratch_operands = 0 : i64, tpu.core_type = #tpu.core_type<tc>, window_params = [{transform_indices = @transform_0, window_bounds = array<i64: 8, 32>}, {pipeline_mode = #tpu.pipeline_mode<synchronous>, transform_indices = @transform_1, window_bounds = array<i64: 32, 128>}, {pipeline_mode = #tpu.pipeline_mode<synchronous>, transform_indices = @transform_2, window_bounds = array<i64: 1, 128>}, {pipeline_mode = #tpu.pipeline_mode<synchronous>, transform_indices = @transform_3, window_bounds = array<i64: 128, 128>}, {pipeline_mode = #tpu.pipeline_mode<synchronous>, transform_indices = @transform_4, window_bounds = array<i64: 1, 128>}, {transform_indices = @transform_5, window_bounds = array<i64: 8, 128>}]} {
    %c0 = arith.constant 0 : index
    %c0_0 = arith.constant 0 : index
    %0 = vector.load %arg1[%c0, %c0_0] : memref<8x32xbf16, #tpu.memory_space<vmem>>, vector<8x32xbf16>
    %c0_1 = arith.constant 0 : index
    %c0_2 = arith.constant 0 : index
    %1 = vector.load %arg2[%c0_1, %c0_2] : memref<32x128xbf16, #tpu.memory_space<vmem>>, vector<32x128xbf16>
    %cst = arith.constant dense<0.000000e+00> : vector<8x128xf32>
    %2 = tpu.matmul %0, %1, %cst {dimension_numbers = #tpu.dot_dimension_numbers<[1], [0], [0], [1], [0, 0, 1, 1], [], []>} : vector<8x32xbf16>, vector<32x128xbf16>, vector<8x128xf32> -> vector<8x128xf32>
    %c0_3 = arith.constant 0 : index
    %c0_4 = arith.constant 0 : index
    %3 = vector.load %arg3[%c0_3, %c0_4] : memref<1x128xf32, #tpu.memory_space<vmem>>, vector<1x128xf32>
    %4 = vector.broadcast %3 : vector<1x128xf32> to vector<8x128xf32>
    %5 = arith.addf %2, %4 : vector<8x128xf32>
    %cst_5 = arith.constant 0.000000e+00 : f32
    %6 = vector.broadcast %cst_5 : f32 to vector<8x128xf32>
    %7 = arith.maximumf %5, %6 : vector<8x128xf32>
    %8 = arith.truncf %7 : vector<8x128xf32> to vector<8x128xbf16>
    %c0_6 = arith.constant 0 : index
    %c0_7 = arith.constant 0 : index
    %9 = vector.load %arg4[%c0_6, %c0_7] : memref<128x128xbf16, #tpu.memory_space<vmem>>, vector<128x128xbf16>
    %cst_8 = arith.constant dense<0.000000e+00> : vector<8x128xf32>
    %10 = tpu.matmul %8, %9, %cst_8 {dimension_numbers = #tpu.dot_dimension_numbers<[1], [0], [0], [1], [0, 0, 1, 1], [], []>} : vector<8x128xbf16>, vector<128x128xbf16>, vector<8x128xf32> -> vector<8x128xf32>
    %c0_9 = arith.constant 0 : index
    %c0_10 = arith.constant 0 : index
    %11 = vector.load %arg5[%c0_9, %c0_10] : memref<1x128xf32, #tpu.memory_space<vmem>>, vector<1x128xf32>
    %12 = vector.broadcast %11 : vector<1x128xf32> to vector<8x128xf32>
    %13 = arith.addf %10, %12 : vector<8x128xf32>
    %cst_11 = arith.constant dense<0xFF800000> : vector<8xf32>
    %14 = vector.multi_reduction <maximumf>, %13, %cst_11 [1] : vector<8x128xf32> to vector<8xf32>
    %15 = vector.shape_cast %14 : vector<8xf32> to vector<8x1xf32>
    %16 = vector.broadcast %15 : vector<8x1xf32> to vector<8x128xf32>
    %17 = arith.subf %13, %16 : vector<8x128xf32>
    %18 = math.exp %17 : vector<8x128xf32>
    %cst_12 = arith.constant dense<0.000000e+00> : vector<8xf32>
    %19 = vector.multi_reduction <add>, %18, %cst_12 [1] : vector<8x128xf32> to vector<8xf32>
    %20 = vector.shape_cast %19 : vector<8xf32> to vector<8x1xf32>
    %21 = vector.broadcast %20 : vector<8x1xf32> to vector<8x128xf32>
    %22 = arith.divf %18, %21 : vector<8x128xf32>
    %c0_13 = arith.constant 0 : index
    %c0_14 = arith.constant 0 : index
    %23 = vector.load %arg6[%c0_13, %c0_14] : memref<8x128xf32, #tpu.memory_space<vmem>>, vector<8x128xf32>
    tpu.vector_store %arg6[%c0_13, %c0_14], %22 {strides = array<i32>} : memref<8x128xf32, #tpu.memory_space<vmem>>, vector<8x128xf32>,
    return
  }
  func.func @transform_0(%arg0: i32) -> (i32, i32) {
    %c0_i32 = arith.constant 0 : i32
    %c0_i32_0 = arith.constant 0 : i32
    return %arg0, %c0_i32 : i32, i32
  }
  func.func @transform_1(%arg0: i32) -> (i32, i32) {
    %c0_i32 = arith.constant 0 : i32
    %c0_i32_0 = arith.constant 0 : i32
    %c0_i32_1 = arith.constant 0 : i32
    return %c0_i32, %c0_i32_0 : i32, i32
  }
  func.func @transform_2(%arg0: i32) -> (i32, i32) {
    %c0_i32 = arith.constant 0 : i32
    %c0_i32_0 = arith.constant 0 : i32
    %c0_i32_1 = arith.constant 0 : i32
    return %c0_i32, %c0_i32_0 : i32, i32
  }
  func.func @transform_3(%arg0: i32) -> (i32, i32) {
    %c0_i32 = arith.constant 0 : i32
    %c0_i32_0 = arith.constant 0 : i32
    %c0_i32_1 = arith.constant 0 : i32
    return %c0_i32, %c0_i32_0 : i32, i32
  }
  func.func @transform_4(%arg0: i32) -> (i32, i32) {
    %c0_i32 = arith.constant 0 : i32
    %c0_i32_0 = arith.constant 0 : i32
    %c0_i32_1 = arith.constant 0 : i32
    return %c0_i32, %c0_i32_0 : i32, i32
  }
  func.func @transform_5(%arg0: i32) -> (i32, i32) {
    %c0_i32 = arith.constant 0 : i32
    %c0_i32_0 = arith.constant 0 : i32
    return %arg0, %c0_i32 : i32, i32
  }
}

</mosaic_0001>

<bundles_post_ra>
// kernel: tpu_custom_call.1
= control target key start
LH: loop header
LB: loop body
LE: loop exit
PB: predicated region body
PF: predicated region fallthrough
CT: control target
= control target key end

     0   :  { %10 = vsyncpa [#allocation3], 0  ;;  %s448_s0 = inlined_call_operand.hbm [shape: bf16[8,32], index: 0, kind: input, shape index: {}]   ;;  %s449_s1 = inlined_call_operand.hbm [shape: bf16[32,128], index: 1, kind: input, shape index: {}]   ;;  %s450_s2 = inlined_call_operand.vmem [shape: f32[1,128], index: 2, kind: input, shape index: {}]   ;;  %s451_s3 = inlined_call_operand.hbm [shape: bf16[128,128], index: 3, kind: input, shape index: {}]   ;;  %s452_s4 = inlined_call_operand.vmem [shape: f32[1,128], index: 4, kind: input, shape index: {}]   ;;  %s453_s5 = inlined_call_operand.hbm [shape: f32[8,128], index: 5, kind: output, shape index: {}]  }
   0x1   :  { %11 = vsyncpa [#allocation6], 0  ;;  %s28_s20 = sshll.u32 %s449_s1, 4  ;;  %s29_s20 = int_to_ptr.hbm [resolvable:$true] %s28_s20 }
   0x2   :  { %12 = vsyncpa [#allocation4], 0  ;;  %s394_s21 = smov [#allocation5]   ;;  %s18_s25 = sshll.u32 %s448_s0, 4  ;;  %s19_s25 = int_to_ptr.hbm [resolvable:$true] %s18_s25 }
   0x3   :  { %s30_s22 = sshll.u32 %s394_s21, 4  ;;  %s395_s26 = smov 64   ;;  %s31_s22 = int_to_ptr.vmem [resolvable:$true] %s30_s22 }
   0x4   :  { %s396_s27 = smov 4   ;;  %s397_s28 = smov [#allocation2]  }
   0x5   :  { %36 = dma.hbm_to_vmem [thread:$0]  %s29_s20, 256, %s31_s22, [#allocation6], %s395_s26, %s395_s26, %s396_s27  }
   0x6   :  { %s20_s29 = sshll.u32 %s397_s28, 4  ;;  %s43_s7 = sshll.u32 %s451_s3, 4  ;;  %s21_s29 = int_to_ptr.vmem [resolvable:$true] %s20_s29  ;;  %s44_s7 = int_to_ptr.hbm [resolvable:$true] %s43_s7 }
   0x7   :  { %23 = dma.hbm_to_vmem [thread:$0]  %s19_s25, 64, %s21_s29, [#allocation3]  }
   0x8   :  { %s398_s1 = smov [#allocation7]  }
   0x9   :  { %s45_s8 = sshll.u32 %s398_s1, 4  ;;  %s46_s8 = int_to_ptr.vmem [resolvable:$true] %s45_s8 }
   0xa   :  { %51 = dma.hbm_to_vmem [thread:$0]  %s44_s7, 1024, %s46_s8, [#allocation6], %s395_s26, %s395_s26, %s396_s27  }
   0xb   :  { %388 = dma.done.wait [#allocation3], 64  }
   0xc   :  { %389 = vsyncadd [#allocation3], 4294967232 }
   0xd   :  { %390 = dma.done.wait [#allocation6], 1280  }
   0xe   :  { %391 = vsyncadd [#allocation6], 4294966016  ;;  %v271_v0 = vld [vmem:[#allocation5 + $0x8] sm:$0xff]  ;;  %v270_v2 = vld [vmem:[#allocation5] sm:$0xff]  ;;  %vm88_vm0 = vcmask 261120   ;;  %s218_s13 = sshll.u32 %s453_s5, 4  ;;  %s219_s13 = int_to_ptr.hbm [resolvable:$true] %s218_s13 }
   0xf   :  { %v279_v1 = vld [vmem:[#allocation7 + $0x38] sm:$0xff]  ;;  %98 = vmatpush.bf16.msra.mxu0 %v271_v0  ;;  %v278_v3 = vld [vmem:[#allocation7 + $0x30] sm:$0xff]  ;;  %v67_v4 = vld [vmem:[#allocation2] sm:$0xf] }
  0x10   :  { %175 = vmatpush.bf16.msra.mxu1 %v279_v1  ;;  %v277_v5 = vld [vmem:[#allocation7 + $0x28] sm:$0xff]  ;;  %v276_v6 = vld [vmem:[#allocation7 + $0x20] sm:$0xff]  ;;  %v275_v7 = vld [vmem:[#allocation7 + $0x18] sm:$0xff] }
  0x11   :  { %v274_v8 = vld [vmem:[#allocation7 + $0x10] sm:$0xff]  ;;  %v273_v9 = vld [vmem:[#allocation7 + $0x8] sm:$0xff]  ;;  %v272_v10 = vld [vmem:[#allocation7] sm:$0xff] }
  0x12   :  { %v286_v11 = vld [vmem:[%s450_s2] ss:$0 sm:$0xff]  ;;  %s399_s2 = smov [#allocation8]  }
  0x13   :  { %99 = vmatpush.bf16.msra.mxu0 %v270_v2  ;;  %v287_v17 = vld [vmem:[%s452_s4] ss:$0 sm:$0xff]  ;;  %s216_s4 = sshll.u32 %s399_s2, 4  ;;  %s217_s4 = int_to_ptr.vmem [resolvable:$true] %s216_s4 }
  0x14   :  { %176 = vmatpush.bf16.msra.mxu1 %v278_v3 }
  0x16   :  { %237 = vmatmul.msk.bf16.vlgmr.msra.gmra.mxu0 %vm88_vm0, %v67_v4 }
  0x18   :  { %177 = vmatpush.bf16.msra.mxu1 %v277_v5 }
  0x1c   :  { %178 = vmatpush.bf16.msra.mxu1 %v276_v6 }
  0x20   :  { %179 = vmatpush.bf16.msra.mxu1 %v275_v7 }
  0x24   :  { %180 = vmatpush.bf16.msra.mxu1 %v274_v8 }
  0x28   :  { %181 = vmatpush.bf16.msra.mxu1 %v273_v9 }
  0x2c   :  { %182 = vmatpush.bf16.msra.mxu1 %v272_v10 }
  0x93   :  { %v101_v12 = vpop.f32.mrf.mxu0 }
  0x94   :  { %v102_v13 = vadd.f32 %v286_v11, %v101_v12 }
  0x96   :  { %v105_v14 = vmax.f32 %v102_v13, 0.0 }
  0x98   :  { %v106_v15 = vpack.c.bf16 %v105_v14, %v105_v14 }
  0x9a   :  { %183 = vmatmul.bf16.vlgmr.msra.gmra.mxu1 %v106_v15 }
  0x9b   :  { %v103_v16 = vpop.f32.mrf.mxu0 }
 0x117   :  { %v184_v18 = vpop.f32.mrf.mxu1 }
 0x118   :  { %v185_v19 = vadd.f32 %v287_v17, %v184_v18 }
 0x11a   :  { %188 = vmax.xlane.f32.xlu0 %v185_v19 }
 0x11f   :  { %v186_v20 = vpop.f32.mrf.mxu1 }
 0x18d   :  { %v189_v21 = vpop.xlane.xlu0 %188 }
 0x18e   :  { %v190_v22 = vsub.f32 %v185_v19, %v189_v21 }
 0x190   :  { %v191_v23 = vmul.f32 1.442695, %v190_v22 }
 0x192   :  { %288 = vpow2.f32 %v191_v23 }
 0x198   :  { %v289_v24 = vpop.eup %288 }
 0x199   :  { %193 = vadd.xlane.f32.xlu0 %v289_v24 }
 0x20c   :  { %v194_v25 = vpop.xlane.xlu0 %193 }
 0x20d   :  { %290 = vrcp.f32 %v194_v25  ;;  %v206_v29 = vand.u32 2147483648, %v194_v25  ;;  %v204_v31 = vand.u32 2147483647, %v194_v25  ;;  %vm200_vm2 = vweird.f32 %v194_v25 }
 0x20f   :  { %v207_v33 = vor.u32 1.1754944e-38, %v206_v29  ;;  %vm205_vm4 = vcmp.eq.f32.partialorder %v204_v31, 8.507059e+37 }
 0x213   :  { %v291_v26 = vpop.eup %290 }
 0x214   :  { %v196_v27 = vmul.f32 %v291_v26, %v194_v25  ;;  %vm201_vm1 = vweird.f32 %v291_v26 }
 0x215   :  { %vm202_vm3 = vmor %vm200_vm2, %vm201_vm1 }
 0x216   :  { %v197_v28 = vsub.f32 1.0, %v196_v27 }
 0x218   :  { %v198_v30 = vmul.f32 %v291_v26, %v197_v28 }
 0x21a   :  { %v199_v32 = vadd.f32 %v291_v26, %v198_v30 }
 0x21c   :  { %v203_v34 = vsel %vm202_vm3, %v291_v26, %v199_v32 }
 0x21d   :  { %v208_v35 = vsel %vm205_vm4, %v207_v33, %v203_v34 }
 0x21e   :  { %v209_v36 = vmul.f32 %v289_v24, %v208_v35 }
 0x220   :  { %210 = vst [vmem:[#allocation8] sm:$0xff] %v209_v36 }
 0x221   :  { %221 = dma.vmem_to_hbm [thread:$0]  %s217_s4, 128, %s219_s13, [#allocation4]  }
 0x222   :  { %392 = dma.done.wait [#allocation4], 128  }
 0x223   :  { %393 = vsyncadd [#allocation4], 4294967168 }
 0x224   :  { %226 = vsyncpa [#allocation3], 1 }
 0x225   :  { %227 = vsyncpa [#allocation6], 1 }
 0x226   :  { %228 = vsyncpa [#allocation4], 1 }

</bundles_post_ra>
